<compile_context>
chip_gen: v7x
topology: tpu7x:2x2x1
jax: 0.10.0
libtpu: 0.0.40
codegen_flags: <defaults>
</compile_context>

<pallas_src>
import jax
import jax.numpy as jnp
from jax.experimental import pallas as pl
from jax.experimental.pallas import tpu as pltpu


def _make_kernel(K, L_conv, L_pool, pool_size):
    def kernel(x_ref, w_ref, b_ref, s_ref, o_ref):
        # x_ref : (1, C_in, L_pad)            MXU dtype, NCL (length on lanes)
        # w_ref : (K, C_out, C_in)            MXU dtype, tap-major conv weight
        # b_ref : (C_out, 1)                  f32 bias column
        # s_ref : (pool_size, L_conv, L_pool) f32 one-hot phase-selection mats
        # o_ref : (1, C_out, L_pool)          f32 output, NCL (lane-dense store)

        # --- Conv1d: K accumulated MXU matmuls, f32 accumulation in registers.
        acc = jnp.dot(w_ref[0], x_ref[0, :, 0:L_conv],
                      preferred_element_type=jnp.float32)
        for k in range(1, K):
            acc = acc + jnp.dot(w_ref[k], x_ref[0, :, k:k + L_conv],
                                preferred_element_type=jnp.float32)

        # --- MaxPool1d along lanes: exact one-hot selection matmuls per phase
        #     (S_j[l, p] = 1 iff l == p*pool_size + j) + elementwise maxima.
        pooled = jnp.dot(acc, s_ref[0], preferred_element_type=jnp.float32)
        for j in range(1, pool_size):
            pooled = jnp.maximum(
                pooled,
                jnp.dot(acc, s_ref[j], preferred_element_type=jnp.float32))

        # --- Bias + ReLU epilogue (f32), single lane-dense store.
        out = jnp.maximum(pooled + b_ref[...], 0.0)
        o_ref[0] = out.astype(o_ref.dtype)

    return kernel


def _nbytes(shape, dtype):
    n = 1
    for d in shape:
        n *= int(d)
    return n * jnp.dtype(dtype).itemsize


def pooling_cnn(x, weight, bias, *, padding, pool_size,
                mxu_dtype=jnp.bfloat16):
    """Forward pass of PoolingCNN: Conv1d -> MaxPool1d(pool_size) -> ReLU.

    x:      (N, C_in, L)       float32   (PyTorch NCL layout)
    weight: (C_out, C_in, K)   float32   (PyTorch Conv1d layout)
    bias:   (C_out,)           float32
    returns (N, C_out, L_pool) float32,
        L_conv = L + 2*padding - K + 1,  L_pool = L_conv // pool_size
    """
    N, C_in, L = x.shape
    C_out, C_in_w, K = weight.shape
    assert C_in_w == C_in
    L_pad = L + 2 * padding
    L_conv = L_pad - K + 1
    L_pool = L_conv // pool_size
    assert L_pool >= 1

    # NCL layout preserved end-to-end: the only input glue is a zero-pad along
    # L (lane-contiguous) fused with the one-shot cast to the MXU dtype.
    x_pad = jnp.pad(x, ((0, 0), (0, 0), (padding, padding))).astype(mxu_dtype)

    # Conv weight, tap-major: w_taps[k] = weight[:, :, k]  -> (K, C_out, C_in).
    w_taps = jnp.transpose(weight, (2, 0, 1)).astype(mxu_dtype)
    # Bias as a column so it lane-broadcasts against (C_out, L_pool).
    b2 = bias.reshape(C_out, 1).astype(jnp.float32)

    # One-hot phase-selection matrices for the max pool (exact in f32):
    # sel[j, l, p] = 1 iff l == p*pool_size + j.
    l_idx = jnp.arange(L_conv).reshape(1, L_conv, 1)
    p_idx = jnp.arange(L_pool).reshape(1, 1, L_pool)
    j_idx = jnp.arange(pool_size).reshape(pool_size, 1, 1)
    sel = (l_idx == p_idx * pool_size + j_idx).astype(jnp.float32)

    # Derive the VMEM limit from the actual (double-buffered) block footprint;
    # cap at 32 MiB so the same code stays portable to v7x's 64 MiB per TC.
    block_bytes = (
        _nbytes((1, C_in, L_pad), mxu_dtype)
        + _nbytes((K, C_out, C_in), mxu_dtype)
        + _nbytes((C_out, 1), jnp.float32)
        + _nbytes((pool_size, L_conv, L_pool), jnp.float32)
        + _nbytes((1, C_out, L_pool), jnp.float32))
    vmem_limit = int(min(32 * 1024 * 1024,
                         max(4 * 1024 * 1024, 8 * block_bytes)))

    kernel = _make_kernel(K, L_conv, L_pool, pool_size)

    out = pl.pallas_call(
        kernel,
        out_shape=jax.ShapeDtypeStruct((N, C_out, L_pool), jnp.float32),
        grid=(N,),
        in_specs=[
            pl.BlockSpec((1, C_in, L_pad), lambda i: (i, 0, 0)),
            pl.BlockSpec((K, C_out, C_in), lambda i: (0, 0, 0)),
            pl.BlockSpec((C_out, 1), lambda i: (0, 0)),
            pl.BlockSpec((pool_size, L_conv, L_pool), lambda i: (0, 0, 0)),
        ],
        out_specs=pl.BlockSpec((1, C_out, L_pool), lambda i: (i, 0, 0)),
        compiler_params=pltpu.CompilerParams(
            dimension_semantics=("parallel",),
            vmem_limit_bytes=vmem_limit,
        ),
    )(x_pad, w_taps, b2, sel)

    # Output is already in PyTorch's NCL layout: no wrapper transpose.
    return out


def _reference(x, weight, bias, *, padding, pool_size):
    """Plain-JAX reference matching PyTorch Conv1d -> MaxPool1d -> ReLU."""
    y = jax.lax.conv_general_dilated(
        x, weight, window_strides=(1,), padding=[(padding, padding)],
        dimension_numbers=("NCH", "OIH", "NCH"))
    y = y + bias[None, :, None]
    y = jax.lax.reduce_window(
        y, -jnp.inf, jax.lax.max,
        window_dimensions=(1, 1, pool_size),
        window_strides=(1, 1, pool_size),
        padding="VALID")
    return jnp.maximum(y, 0.0)


if __name__ == "__main__":
    # Module hyperparameters (small, consistent with the forward pass).
    in_channels, out_channels = 4, 8
    kernel_size, padding, pool_size = 3, 1, 2
    N, L = 2, 16

    key = jax.random.PRNGKey(0)
    kx, kw, kb = jax.random.split(key, 3)

    x = jax.random.normal(kx, (N, in_channels, L), dtype=jnp.float32)
    fan_in = in_channels * kernel_size
    bound = 1.0 / (fan_in ** 0.5)
    weight = jax.random.uniform(
        kw, (out_channels, in_channels, kernel_size),
        minval=-bound, maxval=bound, dtype=jnp.float32)
    bias = jax.random.uniform(
        kb, (out_channels,), minval=-bound, maxval=bound, dtype=jnp.float32)

    ref = _reference(x, weight, bias, padding=padding, pool_size=pool_size)

    # Default path: bf16 MXU operands, f32 accumulation + f32 epilogue.
    out = pooling_cnn(x, weight, bias, padding=padding, pool_size=pool_size)
    out = jax.block_until_ready(out)
    assert out.shape == ref.shape, (out.shape, ref.shape)
    assert jnp.allclose(out, ref, atol=5e-2, rtol=5e-2), "bf16 mismatch vs reference"

    # Full-f32 MXU path (tight tolerance, exact conv semantics).
    out_f32 = pooling_cnn(x, weight, bias, padding=padding, pool_size=pool_size,
                          mxu_dtype=jnp.float32)
    out_f32 = jax.block_until_ready(out_f32)
    assert jnp.allclose(out_f32, ref, atol=1e-4, rtol=1e-4), "f32 mismatch vs reference"

    print("KERNEL_OK")
</pallas_src>

<mosaic_0001>
module attributes {stable_mosaic.version = 11 : i64} {
  func.func @kernel(%arg0: i32, %arg1: memref<1x4x18xbf16, #tpu.memory_space<vmem>>, %arg2: memref<3x8x4xbf16, #tpu.memory_space<vmem>>, %arg3: memref<8x1xf32, #tpu.memory_space<vmem>>, %arg4: memref<2x16x8xf32, #tpu.memory_space<vmem>>, %arg5: memref<1x8x8xf32, #tpu.memory_space<vmem>>) attributes {dimension_semantics = [#tpu.dimension_semantics<parallel>], iteration_bounds = array<i64: 2>, scalar_prefetch = 0 : i64, scratch_operands = 0 : i64, tpu.core_type = #tpu.core_type<tc>, window_params = [{transform_indices = @transform_0, window_bounds = array<i64: 1, 4, 18>}, {pipeline_mode = #tpu.pipeline_mode<synchronous>, transform_indices = @transform_1, window_bounds = array<i64: 3, 8, 4>}, {pipeline_mode = #tpu.pipeline_mode<synchronous>, transform_indices = @transform_2, window_bounds = array<i64: 8, 1>}, {pipeline_mode = #tpu.pipeline_mode<synchronous>, transform_indices = @transform_3, window_bounds = array<i64: 2, 16, 8>}, {transform_indices = @transform_4, window_bounds = array<i64: 1, 8, 8>}]} {
    %c0 = arith.constant 0 : index
    %c0_0 = arith.constant 0 : index
    %c0_1 = arith.constant 0 : index
    %0 = vector.load %arg2[%c0, %c0_0, %c0_1] : memref<3x8x4xbf16, #tpu.memory_space<vmem>>, vector<1x8x4xbf16>
    %1 = vector.shape_cast %0 : vector<1x8x4xbf16> to vector<8x4xbf16>
    %c0_2 = arith.constant 0 : index
    %c0_3 = arith.constant 0 : index
    %c0_4 = arith.constant 0 : index
    %2 = vector.load %arg1[%c0_2, %c0_3, %c0_4] : memref<1x4x18xbf16, #tpu.memory_space<vmem>>, vector<1x4x16xbf16>
    %3 = vector.shape_cast %2 : vector<1x4x16xbf16> to vector<4x16xbf16>
    %cst = arith.constant dense<0.000000e+00> : vector<8x16xf32>
    %4 = tpu.matmul %1, %3, %cst {dimension_numbers = #tpu.dot_dimension_numbers<[1], [0], [0], [1], [0, 0, 1, 1], [], []>} : vector<8x4xbf16>, vector<4x16xbf16>, vector<8x16xf32> -> vector<8x16xf32>
    %c1 = arith.constant 1 : index
    %c0_5 = arith.constant 0 : index
    %c0_6 = arith.constant 0 : index
    %5 = vector.load %arg2[%c1, %c0_5, %c0_6] : memref<3x8x4xbf16, #tpu.memory_space<vmem>>, vector<1x8x4xbf16>
    %6 = vector.shape_cast %5 : vector<1x8x4xbf16> to vector<8x4xbf16>
    %c0_7 = arith.constant 0 : index
    %c0_8 = arith.constant 0 : index
    %c1_9 = arith.constant 1 : index
    %7 = vector.load %arg1[%c0_7, %c0_8, %c1_9] : memref<1x4x18xbf16, #tpu.memory_space<vmem>>, vector<1x4x16xbf16>
    %8 = vector.shape_cast %7 : vector<1x4x16xbf16> to vector<4x16xbf16>
    %cst_10 = arith.constant dense<0.000000e+00> : vector<8x16xf32>
    %9 = tpu.matmul %6, %8, %cst_10 {dimension_numbers = #tpu.dot_dimension_numbers<[1], [0], [0], [1], [0, 0, 1, 1], [], []>} : vector<8x4xbf16>, vector<4x16xbf16>, vector<8x16xf32> -> vector<8x16xf32>
    %10 = arith.addf %4, %9 : vector<8x16xf32>
    %c2 = arith.constant 2 : index
    %c0_11 = arith.constant 0 : index
    %c0_12 = arith.constant 0 : index
    %11 = vector.load %arg2[%c2, %c0_11, %c0_12] : memref<3x8x4xbf16, #tpu.memory_space<vmem>>, vector<1x8x4xbf16>
    %12 = vector.shape_cast %11 : vector<1x8x4xbf16> to vector<8x4xbf16>
    %c0_13 = arith.constant 0 : index
    %c0_14 = arith.constant 0 : index
    %c2_15 = arith.constant 2 : index
    %13 = vector.load %arg1[%c0_13, %c0_14, %c2_15] : memref<1x4x18xbf16, #tpu.memory_space<vmem>>, vector<1x4x16xbf16>
    %14 = vector.shape_cast %13 : vector<1x4x16xbf16> to vector<4x16xbf16>
    %cst_16 = arith.constant dense<0.000000e+00> : vector<8x16xf32>
    %15 = tpu.matmul %12, %14, %cst_16 {dimension_numbers = #tpu.dot_dimension_numbers<[1], [0], [0], [1], [0, 0, 1, 1], [], []>} : vector<8x4xbf16>, vector<4x16xbf16>, vector<8x16xf32> -> vector<8x16xf32>
    %16 = arith.addf %10, %15 : vector<8x16xf32>
    %c0_17 = arith.constant 0 : index
    %c0_18 = arith.constant 0 : index
    %c0_19 = arith.constant 0 : index
    %17 = vector.load %arg4[%c0_17, %c0_18, %c0_19] : memref<2x16x8xf32, #tpu.memory_space<vmem>>, vector<1x16x8xf32>
    %18 = vector.shape_cast %17 : vector<1x16x8xf32> to vector<16x8xf32>
    %cst_20 = arith.constant dense<0.000000e+00> : vector<8x8xf32>
    %19 = tpu.matmul %16, %18, %cst_20 {dimension_numbers = #tpu.dot_dimension_numbers<[1], [0], [0], [1], [0, 0, 1, 1], [], []>} : vector<8x16xf32>, vector<16x8xf32>, vector<8x8xf32> -> vector<8x8xf32>
    %c1_21 = arith.constant 1 : index
    %c0_22 = arith.constant 0 : index
    %c0_23 = arith.constant 0 : index
    %20 = vector.load %arg4[%c1_21, %c0_22, %c0_23] : memref<2x16x8xf32, #tpu.memory_space<vmem>>, vector<1x16x8xf32>
    %21 = vector.shape_cast %20 : vector<1x16x8xf32> to vector<16x8xf32>
    %cst_24 = arith.constant dense<0.000000e+00> : vector<8x8xf32>
    %22 = tpu.matmul %16, %21, %cst_24 {dimension_numbers = #tpu.dot_dimension_numbers<[1], [0], [0], [1], [0, 0, 1, 1], [], []>} : vector<8x16xf32>, vector<16x8xf32>, vector<8x8xf32> -> vector<8x8xf32>
    %23 = arith.maximumf %19, %22 : vector<8x8xf32>
    %c0_25 = arith.constant 0 : index
    %c0_26 = arith.constant 0 : index
    %24 = vector.load %arg3[%c0_25, %c0_26] : memref<8x1xf32, #tpu.memory_space<vmem>>, vector<8x1xf32>
    %25 = vector.broadcast %24 : vector<8x1xf32> to vector<8x8xf32>
    %26 = arith.addf %23, %25 : vector<8x8xf32>
    %cst_27 = arith.constant 0.000000e+00 : f32
    %27 = vector.broadcast %cst_27 : f32 to vector<8x8xf32>
    %28 = arith.maximumf %26, %27 : vector<8x8xf32>
    %c0_28 = arith.constant 0 : index
    %c0_29 = arith.constant 0 : index
    %c0_30 = arith.constant 0 : index
    %29 = vector.load %arg5[%c0_28, %c0_29, %c0_30] : memref<1x8x8xf32, #tpu.memory_space<vmem>>, vector<1x8x8xf32>
    %30 = vector.shape_cast %29 : vector<1x8x8xf32> to vector<8x8xf32>
    %31 = vector.shape_cast %28 : vector<8x8xf32> to vector<1x8x8xf32>
    tpu.vector_store %arg5[%c0_28, %c0_29, %c0_30], %31 {strides = array<i32>} : memref<1x8x8xf32, #tpu.memory_space<vmem>>, vector<1x8x8xf32>,
    return
  }
  func.func @transform_0(%arg0: i32) -> (i32, i32, i32) {
    %c0_i32 = arith.constant 0 : i32
    %c0_i32_0 = arith.constant 0 : i32
    %c0_i32_1 = arith.constant 0 : i32
    return %arg0, %c0_i32, %c0_i32_0 : i32, i32, i32
  }
  func.func @transform_1(%arg0: i32) -> (i32, i32, i32) {
    %c0_i32 = arith.constant 0 : i32
    %c0_i32_0 = arith.constant 0 : i32
    %c0_i32_1 = arith.constant 0 : i32
    %c0_i32_2 = arith.constant 0 : i32
    return %c0_i32, %c0_i32_0, %c0_i32_1 : i32, i32, i32
  }
  func.func @transform_2(%arg0: i32) -> (i32, i32) {
    %c0_i32 = arith.constant 0 : i32
    %c0_i32_0 = arith.constant 0 : i32
    %c0_i32_1 = arith.constant 0 : i32
    return %c0_i32, %c0_i32_0 : i32, i32
  }
  func.func @transform_3(%arg0: i32) -> (i32, i32, i32) {
    %c0_i32 = arith.constant 0 : i32
    %c0_i32_0 = arith.constant 0 : i32
    %c0_i32_1 = arith.constant 0 : i32
    %c0_i32_2 = arith.constant 0 : i32
    return %c0_i32, %c0_i32_0, %c0_i32_1 : i32, i32, i32
  }
  func.func @transform_4(%arg0: i32) -> (i32, i32, i32) {
    %c0_i32 = arith.constant 0 : i32
    %c0_i32_0 = arith.constant 0 : i32
    %c0_i32_1 = arith.constant 0 : i32
    return %arg0, %c0_i32, %c0_i32_0 : i32, i32, i32
  }
}

</mosaic_0001>

<bundles_post_ra>
// kernel: tpu_custom_call.1
= control target key start
LH: loop header
LB: loop body
LE: loop exit
PB: predicated region body
PF: predicated region fallthrough
CT: control target
= control target key end

     0   :  { %9 = vsyncpa [#allocation3], 0  ;;  %s958_s0 = inlined_call_operand.vmem [shape: bf16[2,4,18], index: 0, kind: input, shape index: {}]   ;;  %s959_s1 = inlined_call_operand.vmem [shape: bf16[3,8,4], index: 1, kind: input, shape index: {}]   ;;  %s960_s2 = inlined_call_operand.vmem [shape: f32[8,1], index: 2, kind: input, shape index: {}]   ;;  %s961_s3 = inlined_call_operand.vmem [shape: f32[2,16,8], index: 3, kind: input, shape index: {}]   ;;  %s962_s4 = inlined_call_operand.hbm [shape: f32[2,8,8], index: 4, kind: output, shape index: {}]  }
   0x1   :  { %11 = vsyncpa [#allocation3 + $0x1], 0  ;;  %s815_s15 = smov 0   ;;  %s817_s16 = smov 0  }
   0x2   :  { %s819_s17 = smov 0   ;;  %s821_s18 = smov 0  }
   0x3 LB: > { %s836_s19 = sadd.s32 4294967295, %s780_s18   ;;  %s595_s20 = sadd.s32 4294967294, %s780_s18   ;;  %s780_s18 = sphi %s821_s18, %s968_s18   ;;  %s776_s17 = sphi %s819_s17, %s967_s17   ;;  %s772_s16 = sphi %s817_s16, %s966_s16   ;;  %s768_s15 = sphi %s815_s15, %s965_s15  }
   0x4   : > { %s840_s21 = sadd.s32 1, %s780_s18   ;;  %s113_s22 = sadd.s32 1, %s776_s17 }
   0x5   : > { %s110_s23 = ssub.s32 %s780_s18, %s840_s21  ;;  %p123_p0 = scmp.ne.s32.totalorder %s776_s17, %s772_s16 }
   0x6   : > { %p111_p1 = scmp.eq.s32.totalorder %s110_s23, 0  ;;  %p124_p2 = scmp.eq.s32.totalorder %s836_s19, 1 }
   0x7   : > { %p129_p3 = scmp.ne.s32.totalorder %s772_s16, %s768_s15  ;;  %p130_p4 = scmp.eq.s32.totalorder %s595_s20, 1 }
   0x8   : > { %s851_s24 = scalar_select %p111_p1, %s776_s17, %s113_s22  }
   0x9   : > { %p853_p5 = por %p124_p2, %p123_p0  ;;  %p857_p6 = por %p130_p4, %p129_p3 }
   0xa   : > { %p598_p7 = scmp.ge.s32.totalorder %s780_s18, 1  ;;  %p164_p8 = scmp.lt.s32.totalorder %s780_s18, 3 }
   0xc   : > { %p165_p9 = pnand %p598_p7, %p164_p8 }
   0xd   : > { %p189_p10 = scmp.lt.s32.totalorder (!%p165_p9), %s836_s19, 1  ;;  %v202_v0 = vlaneseq (!%p165_p9)  ;;  %v782_v1 = vmov (!%p165_p9), 1983009808   ;;  %v783_v3 = vmov (!%p165_p9), 0.0   ;;  %vm784_vm0 = vmmov (!%p165_p9), 0   ;;  %s785_s8 = smov (!%p165_p9), 127  }
   0xe   : > { %168 = sbr.rel (%p165_p9) target bundleno = 601 (0x259), region = 36  ;;  %v200_v2 = vunpack.c.l.s4 (!%p165_p9), %v782_v1  ;;  %633 = vmatprep.subr.bf16.mxu0 (!%p165_p9), %v783_v3  ;;  %627 = vmatprep.subr.bf16.mxu1 (!%p165_p9), %v783_v3  ;;  %vm212_vm1 = vcmask (!%p165_p9), 1041408   ;;  %v194_v10 = vld [vmem:[%s959_s1] sm:$0xf] (!%p165_p9)  ;;  %vm208_vm2 = vcmask (!%p165_p9), 31744   ;;  %s786_s9 = smov (!%p165_p9), 126  }
   0xf   : > { %v203_v4 = vshrl.u32 (!%p165_p9), %v202_v0, 7  ;;  %635 = vmatprep.mubr.msk.bf16.mxu0 (!%p165_p9), %vm784_vm0, %v783_v3  ;;  %629 = vmatprep.mubr.msk.bf16.mxu1 (!%p165_p9), %vm784_vm0, %v783_v3  ;;  %v601_v14 = vld [vmem:[%s959_s1 + $0x4] sm:$0xf] (!%p165_p9)  ;;  %v787_v15 = vmov (!%p165_p9), 0.0|0.0   ;;  %v604_v18 = vld [vmem:[%s959_s1 + $0x8] sm:$0xf] (!%p165_p9) }
  0x10   : > { %v201_v5 = vunpack.c.0.s8 (!%p165_p9), %v200_v2  ;;  %v362_v19 = vld [vmem:[%s961_s3] sm:$0xff] (!%p165_p9)  ;;  %v363_v20 = vld [vmem:[%s961_s3 + $0x8] sm:$0xff] (!%p165_p9)  ;;  %v788_v23 = vmov (!%p165_p9), 0   ;;  %v608_v25 = vld [vmem:[%s961_s3 + $0x10] sm:$0xff] (!%p165_p9)  ;;  %vm364_vm3 = vcmask (!%p165_p9), 130048   ;;  %s186_s7 = sand.u32 (!%p165_p9), 1, %s772_s16  }
  0x11   : > { %v660_v21 = vpack.c.bf16 (!%p165_p9), %v363_v20, %v362_v19  ;;  %v512_v22 = vld [vmem:[%s960_s2] sm:$0xff] (!%p165_p9)  ;;  %716 = vset.pattern.permute.xlu1 (!%p165_p9), %v788_v23  ;;  %717 = vset.pattern.permute.xlu0 (!%p165_p9), %v788_v23  ;;  %v609_v26 = vld [vmem:[%s961_s3 + $0x18] sm:$0xff] (!%p165_p9)  ;;  %vm520_vm4 = vcmask (!%p165_p9), 64512   ;;  %s523_s20 = scalar_lea.sflag (!%p165_p9), [#allocation3], %s186_s7 }
  0x12   : > { %v204_v6 = vsub.s32 (!%p165_p9), %v201_v5, %v203_v4  ;;  %515 = vperm.xlu1 (!%p165_p9), %716, %v512_v22   ;;  %v663_v31 = vpack.c.bf16 (!%p165_p9), %v609_v26, %v608_v25 }
  0x15   : > { %s190_s27 = scalar_select %p189_p10, %s836_s19, 1 }
  0x17   : > { %s600_s28 = sshll.u32 %s190_s27, 1 }
  0x18   : > { %s192_s5 = scalar_lea.vmem %s958_s0, %s600_s28 }
  0x19   : > { %v195_v7 = vld [vmem:[%s192_s5] sm:$0x3] }
  0x1a   : > { %v205_v8 = vrot.slane %v195_v7, %v204_v6  ;;  %v260_v9 = vsel %vm212_vm1, %v195_v7, 0  ;;  %v605_v11 = vld.sshfl [vmem:[%s192_s5] sm:$0x3 pattern:$0x76325410] }
  0x1b   : > { %634 = vmatpush3.bf16.msra.mxu0 %v260_v9 }
  0x1c   : > { %206 = vrot.lane.b32.xlu0 %v205_v8, %s785_s8  ;;  %639 = vmatprep.subr.bf16.mxu0 %v783_v3  ;;  %s599_s8 = sshll.u32 %s186_s7, 3 }
  0x1d   : > { %s188_s10 = scalar_lea.vmem [#allocation2], %s599_s8 }
  0x1e   : > { %636 = vmatmul.mubr.msk.bf16.vlgmr.msra.gmra.mrb[0].mxu0 %vm208_vm2, %v194_v10  ;;  %s536_s11 = sshll.u32 %s188_s10, 4  ;;  %s918_s11 = int_to_ptr.vmem [resolvable:$true] %s536_s11 }
  0x1f   : > { %641 = vmatprep.mubr.msk.bf16.mxu0 %vm784_vm0, %v783_v3  ;;  %s718_s22 = scalar_lea.vmem %s918_s11, 128 }
  0x20   : > { %313 = vrot.lane.b32.xlu0 %v605_v11, %s786_s9  ;;  %s612_s9 = sshll.u32 %s836_s19, 7  ;;  %p719_p11 = scmp.ne.s32.totalorder %s918_s11, %s718_s22 }
  0x21   : > { %s916_s14 = scalar_lea.hbm %s962_s4, %s612_s9  ;;  %s789_s19 = smov [#allocation2]  }
  0x22   : > { %p720_p12 = pnand %p719_p11, %p853_p5  ;;  %s722_s23 = sshll.u32 %s789_s19, 4  ;;  %s723_s23 = int_to_ptr.vmem [resolvable:$false] %s722_s23 }
  0x23   : > { %s724_s27 = scalar_lea.vmem %s723_s23, 256  ;;  %p725_p0 = scmp.lt.s32.totalorder %s918_s11, %s723_s23 }
  0x24   : > { %p721_p13 = pneg %p720_p12  ;;  %p726_p1 = scmp.lt.s32.totalorder %s724_s27, %s718_s22 }
  0x26   : > { %p727_p2 = por %p726_p1, %p725_p0 }
  0x28   : > { %p728_p3 = pnand %p727_p2, %p721_p13 }
  0x8e   : > { %v207_v12 = vpop.permute.xlu0 %206 }
  0x8f   : > { %v214_v13 = vsel %vm212_vm1, %v207_v12, 0 }
  0x90   : > { %628 = vmatpush3.bf16.msra.mxu1 %v214_v13 }
  0x91   : > { %659 = vmatprep.subr.bf16.mxu1 %v787_v15  ;;  %v516_v39 = vpop.permute.xlu1 %515 }
  0x92   : > { %v314_v16 = vpop.permute.xlu0 %313 }
  0x93   : > { %v319_v17 = vsel %vm212_vm1, %v314_v16, 0  ;;  %630 = vmatmul.mubr.msk.bf16.vlgmr.msra.gmra.mrb[0].mxu1 %vm208_vm2, %v601_v14 }
  0x94   : > { %640 = vmatpush3.bf16.msra.mxu0 %v319_v17  ;;  %649 = vmatprep.mubr.msk.f32.mxu1 %vm784_vm0, %v783_v3 }
  0x95   : > { %661 = vmatpush3.bf16.msra.mxu1 %v660_v21 }
  0x96   : > { %662 = vmatprep.subr.bf16.mxu1 %v787_v15 }
  0x97   : > { %642 = vmatmul.mubr.msk.bf16.vlgmr.msra.gmra.mrb[0].mxu0 %vm208_vm2, %v604_v18 }
 0x166   : > { %v250_v24 = vpop.f32.mrb[0].mxu1 }
 0x167   : > { %v631_v27 = vpop.f32.mrb[1].mxu1 }
 0x168   : > { %v253_v28 = vpop.f32.mrb[2].mxu1 }
 0x169   : > { %v632_v29 = vpop.f32.mrb[3].mxu1 }
 0x16a   : > { %v355_v30 = vpop.f32.mrb[0].mxu0 }
 0x16b   : > { %v665_v32 = vadd.f32 %v355_v30, %v250_v24  ;;  %v643_v33 = vpop.f32.mrb[1].mxu0 }
 0x16c   : > { %v358_v34 = vpop.f32.mrb[2].mxu0 }
 0x16d   : > { %v644_v35 = vpop.f32.mrb[3].mxu0  ;;  %650 = vmatmul.mubr.msk.f32.vlgmr.msra.gmra.mrb[4].mxu1 %vm364_vm3, %v665_v32 }
 0x16e   : > { %664 = vmatpush3.bf16.msra.mxu1 %v663_v31  ;;  %656 = vmatprep.mubr.msk.f32.mxu1 %vm784_vm0, %v783_v3 }
 0x171   : > { %657 = vmatmul.mubr.msk.f32.vlgmr.msra.gmra.mrb[6].mxu1 %vm364_vm3, %v665_v32 }
 0x240   : > { %v434_v36 = vpop.f32.mrb[4].mxu1 }
 0x241   : > { %v651_v37 = vpop.f32.mrb[5].mxu1 }
 0x244   : > { %v507_v38 = vpop.f32.mrb[6].mxu1 }
 0x245   : > { %v511_v40 = vmax.f32 %v434_v36, %v507_v38  ;;  %v658_v41 = vpop.f32.mrb[7].mxu1 }
 0x247   : > { %v518_v42 = vadd.f32 %v516_v39, %v511_v40 }
 0x249   : > { %v519_v43 = vmax.f32 %v518_v42, 0.0 }
 0x24b   : > { %521 = vst.msk [vmem:[%s188_s10] sm:$0xff] %vm520_vm4, %v519_v43 }
 0x24c   : > { %731 = shalt.err (!%p728_p3)
}
 0x24d   : > { %s732_s28 = scalar_lea.hbm %s916_s14, 128  ;;  %s736_s5 = scalar_lea.hbm %s962_s4, 256 }
 0x24e   : > { %p733_p4 = scmp.ne.s32.totalorder %s916_s14, %s732_s28  ;;  %p737_p9 = scmp.lt.u32.totalorder %s916_s14, %s962_s4 }
 0x24f   : > { %p738_p10 = scmp.lt.u32.totalorder %s736_s5, %s732_s28  ;;  %p740_p12 = scmp.lt.u32.totalorder %s732_s28, %s916_s14 }
 0x250   : > { %p734_p7 = pnand %p733_p4, %p853_p5 }
 0x251   : > { %p739_p11 = por %p738_p10, %p737_p9 }
 0x252   : > { %p735_p8 = pneg %p734_p7 }
 0x253   : > { %p741_p13 = por %p740_p12, %p739_p11 }
 0x255   : > { %p742_p0 = pnand %p741_p13, %p735_p8 }
 0x257   : > { %745 = shalt.err (!%p742_p0)
}
 0x258   : > { %670 = dma.vmem_to_hbm [thread:$0]  (%p853_p5), %s918_s11, 128, %s916_s14, %s523_s20  }
 0x259 PF: > { %p676_p1 = scmp.ge.s32.totalorder %s780_s18, 2  ;;  %s548_s8 = sand.u32 1, %s768_s15  }
 0x25a   : > { %s549_s9 = scalar_lea.sflag [#allocation3], %s548_s8 }
 0x25b   : > { %p673_p2 = pnand %p676_p1, %p857_p6 }
 0x25d   : > { %763 = dma.done.wait (!%p673_p2), %s549_s9, 128  }
 0x25e   : > { %765 = vsyncadd (!%p673_p2), %s549_s9, 4294967168  ;;  %p14_p3 = scmp.ge.s32.totalorder %s840_s21, 4   ;;  %s965_s15 = smov %s772_s16 }
 0x25f   : > { %s966_s16 = smov %s776_s17  ;;  %s967_s17 = smov %s851_s24 }
 0x260   : > { %s968_s18 = smov %s840_s21  ;;  %16 = sbr.rel (!%p14_p3) target bundleno = 3 (0x3), region = 74 }
 0x267   :  { %554 = vsyncpa [#allocation3], 1 }
 0x268   :  { %556 = vsyncpa [#allocation3 + $0x1], 1 }

</bundles_post_ra>
